<compile_context>
chip_gen: v7x
topology: tpu7x:2x2x1
jax: 0.10.0
libtpu: 0.0.40
codegen_flags: <defaults>
</compile_context>

<pallas_src>
import functools

import jax
import jax.numpy as jnp
from jax.experimental import pallas as pl
from jax.experimental.pallas import tpu as pltpu

LANES = 128      # lane width: every packed weight has 128 output columns
SUBLANES = 8     # f32 sublane packing


def _round_up(x, m):
    return (x + m - 1) // m * m


def dueling_dqn_kernel(x_ref, p_ref, out_ref, *, sp, a):
    """One grid step: (TB, Sp) states -> (TB, 128) lane-dense padded Q block.

    Packed parameter layout (rows; all segments 8-row aligned):
      [0      , sp      )  W1  : real (S,  H1) in [:S, :H1]
      [sp     , sp+128  )  W2  : real (H1, H1)
      [sp+128 , sp+256  )  Wb1 : cols [0:H3)=fc_state_1, [H3:2H3)=fc_advantages_1
      [sp+256 , sp+384  )  Wb2 : block-diag; rows[H3:2H3) x cols[0:A)=fc_advantages_2,
                                 rows[0:H3) x col A = fc_state_2
      [sp+384 , sp+392  )  bias rows: 0=b1, 1=b2, 2=bb1, 3=bb2
    """
    x = x_ref[...]                                    # (TB, Sp)

    r = 0
    w1 = p_ref[r:r + sp, :]
    r += sp
    w2 = p_ref[r:r + LANES, :]
    r += LANES
    wb1 = p_ref[r:r + LANES, :]
    r += LANES
    wb2 = p_ref[r:r + LANES, :]
    r += LANES
    biases = p_ref[r:r + SUBLANES, :]                 # (8, 128)
    b1 = biases[0:1, :]
    b2 = biases[1:2, :]
    bb1 = biases[2:3, :]
    bb2 = biases[3:4, :]

    # fc1 -> relu (padded columns of w1/b1 are zero, so padded lanes stay 0)
    h = jnp.dot(x, w1, preferred_element_type=jnp.float32) + b1
    h = jnp.maximum(h, 0.0)
    # fc2 -> relu
    h = jnp.dot(h, w2, preferred_element_type=jnp.float32) + b2
    h = jnp.maximum(h, 0.0)
    # fused value|advantage hidden layer -> relu
    hb = jnp.dot(h, wb1, preferred_element_type=jnp.float32) + bb1
    hb = jnp.maximum(hb, 0.0)
    # fused block-diagonal heads: cols [0:A) = advantages, col A = state value
    q_raw = jnp.dot(hb, wb2, preferred_element_type=jnp.float32) + bb2

    adv = q_raw[:, 0:a]                               # only the A real columns
    sv = q_raw[:, a:a + 1]                            # (TB, 1) state value
    adv_mean = jnp.mean(adv, axis=1, keepdims=True)   # mean over real actions only

    # Lane-dense store: columns [0:A) hold Q = V + (A - mean(A)); the remaining
    # padded lanes hold garbage the wrapper slices away.
    out_ref[...] = sv + (q_raw - adv_mean)


def pack_params(params, state_size, action_size):
    """Pack + fuse + tile-pad all weights/biases into one (n_rows, 128) buffer.

    Called ONCE per model (not per forward call).
    """
    (w1, b1, w2, b2, ws1, bs1, ws2, bs2, wa1, ba1, wa2, ba2) = params
    S, A = state_size, action_size
    H1, H3 = 6 * S, 4 * S
    assert H1 <= LANES and 2 * H3 <= LANES and A + 1 <= LANES, (
        "packed layout assumes all layer widths fit in one 128-lane tile "
        "(hard scalability boundary: S <= 21 and A <= 127)")
    sp = _round_up(S, SUBLANES)

    w1p = jnp.zeros((sp, LANES), jnp.float32).at[:S, :H1].set(w1)
    w2p = jnp.zeros((LANES, LANES), jnp.float32).at[:H1, :H1].set(w2)
    wb1p = (jnp.zeros((LANES, LANES), jnp.float32)
            .at[:H1, :H3].set(ws1)
            .at[:H1, H3:2 * H3].set(wa1))
    wb2p = (jnp.zeros((LANES, LANES), jnp.float32)
            .at[H3:2 * H3, :A].set(wa2)
            .at[:H3, A:A + 1].set(ws2))
    biasp = (jnp.zeros((SUBLANES, LANES), jnp.float32)
             .at[0, :H1].set(b1.reshape(-1))
             .at[1, :H1].set(b2.reshape(-1))
             .at[2, :H3].set(bs1.reshape(-1))
             .at[2, H3:2 * H3].set(ba1.reshape(-1))
             .at[3, :A].set(ba2.reshape(-1))
             .at[3, A:A + 1].set(bs2.reshape(-1)))
    packed = jnp.concatenate([w1p, w2p, wb1p, wb2p, biasp], axis=0)
    return packed, sp


def _choose_batch_tile(batch, max_tile):
    """Rows per grid step: multiple of 8, <= max_tile, and (when the batch is
    big enough to matter) at least 2 grid steps so both v7x TensorCores are
    used via the 'parallel' batch axis."""
    bp = _round_up(max(batch, 1), SUBLANES)
    if bp <= 2 * SUBLANES:                     # tiny batch: one small step
        return bp
    n_tiles = max(2, pl.cdiv(bp, max_tile))
    return min(max_tile, _round_up(pl.cdiv(bp, n_tiles), SUBLANES))


def make_dueling_dqn_forward(params, state_size, action_size,
                             max_batch_tile=512):
    """Pack the parameters once and return a jitted forward(state) -> Q.

    max_batch_tile: per-grid-step batch rows. 512 is a good default for
    v6e/v7x; sweep 256-1024, and prefer ~256 on v5e (single store slot,
    lower HBM bandwidth).
    """
    packed, sp = pack_params(params, state_size, action_size)
    n_rows = packed.shape[0]
    A = action_size

    @jax.jit
    def forward(packed_buf, state):
        B, S = state.shape
        tb = _choose_batch_tile(B, max_batch_tile)

        # Only materialize a padded copy of the batch when it is actually
        # needed (feature dim not sublane-aligned or batch not tile-aligned);
        # large aligned batches go straight to the kernel (no extra HBM pass).
        if (S != sp) or (B % tb != 0):
            bp = _round_up(B, tb)
            x = jnp.zeros((bp, sp), jnp.float32).at[:B, :S].set(
                state.astype(jnp.float32))
        else:
            bp = B
            x = state.astype(jnp.float32)

        grid = (bp // tb,)
        cost = pl.CostEstimate(
            flops=2 * bp * (sp * LANES + 3 * LANES * LANES),
            transcendentals=0,
            bytes_accessed=4 * (bp * sp + n_rows * LANES + bp * LANES),
        )

        out = pl.pallas_call(
            functools.partial(dueling_dqn_kernel, sp=sp, a=A),
            out_shape=jax.ShapeDtypeStruct((bp, LANES), jnp.float32),
            grid_spec=pltpu.PrefetchScalarGridSpec(
                num_scalar_prefetch=0,
                grid=grid,
                in_specs=[
                    # states: tiled over batch
                    pl.BlockSpec((tb, sp), lambda i: (i, 0)),
                    # packed params: constant block index -> VMEM-resident
                    pl.BlockSpec((n_rows, LANES), lambda i: (0, 0)),
                ],
                out_specs=pl.BlockSpec((tb, LANES), lambda i: (i, 0)),
            ),
            compiler_params=pltpu.CompilerParams(
                dimension_semantics=("parallel",)),
            cost_estimate=cost,
        )(x, packed_buf)
        return out[:B, :A]

    # Bind the packed buffer once; every call only pays the jitted forward.
    return functools.partial(forward, packed)


def init_linear(key, fan_in, fan_out):
    """PyTorch-style nn.Linear default init, stored as (in, out)."""
    k_w, k_b = jax.random.split(key)
    bound = 1.0 / jnp.sqrt(jnp.float32(fan_in))
    w = jax.random.uniform(k_w, (fan_in, fan_out), jnp.float32, -bound, bound)
    b = jax.random.uniform(k_b, (1, fan_out), jnp.float32, -bound, bound)
    return w, b


def make_params(key, state_size, action_size):
    keys = jax.random.split(key, 6)
    w1, b1 = init_linear(keys[0], state_size, state_size * 6)
    w2, b2 = init_linear(keys[1], state_size * 6, state_size * 6)
    ws1, bs1 = init_linear(keys[2], state_size * 6, state_size * 4)
    ws2, bs2 = init_linear(keys[3], state_size * 4, 1)
    wa1, ba1 = init_linear(keys[4], state_size * 6, state_size * 4)
    wa2, ba2 = init_linear(keys[5], state_size * 4, action_size)
    return (w1, b1, w2, b2, ws1, bs1, ws2, bs2, wa1, ba1, wa2, ba2)


def reference_forward(state, params):
    """Pure-JAX reference mirroring the PyTorch forward (unfused, unpadded)."""
    (w1, b1, w2, b2, ws1, bs1, ws2, bs2, wa1, ba1, wa2, ba2) = params
    h1 = jax.nn.relu(state @ w1 + b1)
    h2 = jax.nn.relu(h1 @ w2 + b2)
    sv = jax.nn.relu(h2 @ ws1 + bs1) @ ws2 + bs2
    adv = jax.nn.relu(h2 @ wa1 + ba1) @ wa2 + ba2
    return sv + (adv - adv.mean(axis=1, keepdims=True))


if __name__ == "__main__":
    state_size = 8
    action_size = 4
    batch = 2

    key = jax.random.PRNGKey(0)
    k_params, k_state = jax.random.split(key)

    params = make_params(k_params, state_size, action_size)
    state = jax.random.normal(k_state, (batch, state_size), jnp.float32)

    # Pack once, jit once; per-call path is a single jitted dispatch.
    forward = make_dueling_dqn_forward(params, state_size, action_size)

    out = jax.block_until_ready(forward(state))
    ref = reference_forward(state, params)
    assert out.shape == (batch, action_size)
    assert jnp.allclose(out, ref, atol=1e-5, rtol=1e-5), "mismatch vs reference"

    # Also exercise the multi-tile (grid > 1, padded-tail) path.
    state_big = jax.random.normal(k_state, (40, state_size), jnp.float32)
    out_big = jax.block_until_ready(forward(state_big))
    ref_big = reference_forward(state_big, params)
    assert out_big.shape == (40, action_size)
    assert jnp.allclose(out_big, ref_big, atol=1e-4, rtol=1e-4), "big-batch mismatch"

    print("KERNEL_OK")
</pallas_src>

<mosaic_0001>
module attributes {stable_mosaic.version = 11 : i64} {
  func.func @dueling_dqn_kernel(%arg0: i32, %arg1: memref<8x8xf32, #tpu.memory_space<vmem>>, %arg2: memref<400x128xf32, #tpu.memory_space<vmem>>, %arg3: memref<8x128xf32, #tpu.memory_space<vmem>>) attributes {dimension_semantics = [#tpu.dimension_semantics<parallel>], iteration_bounds = array<i64: 1>, scalar_prefetch = 0 : i64, scratch_operands = 0 : i64, tpu.core_type = #tpu.core_type<tc>, window_params = [{transform_indices = @transform_0, window_bounds = array<i64: 8, 8>}, {pipeline_mode = #tpu.pipeline_mode<synchronous>, transform_indices = @transform_1, window_bounds = array<i64: 400, 128>}, {transform_indices = @transform_2, window_bounds = array<i64: 8, 128>}]} {
    %c0 = arith.constant 0 : index
    %c0_0 = arith.constant 0 : index
    %0 = vector.load %arg1[%c0, %c0_0] : memref<8x8xf32, #tpu.memory_space<vmem>>, vector<8x8xf32>
    %c0_1 = arith.constant 0 : index
    %c0_2 = arith.constant 0 : index
    %1 = vector.load %arg2[%c0_1, %c0_2] : memref<400x128xf32, #tpu.memory_space<vmem>>, vector<8x128xf32>
    %c8 = arith.constant 8 : index
    %c0_3 = arith.constant 0 : index
    %2 = vector.load %arg2[%c8, %c0_3] : memref<400x128xf32, #tpu.memory_space<vmem>>, vector<128x128xf32>
    %c136 = arith.constant 136 : index
    %c0_4 = arith.constant 0 : index
    %3 = vector.load %arg2[%c136, %c0_4] : memref<400x128xf32, #tpu.memory_space<vmem>>, vector<128x128xf32>
    %c264 = arith.constant 264 : index
    %c0_5 = arith.constant 0 : index
    %4 = vector.load %arg2[%c264, %c0_5] : memref<400x128xf32, #tpu.memory_space<vmem>>, vector<128x128xf32>
    %c392 = arith.constant 392 : index
    %c0_6 = arith.constant 0 : index
    %5 = vector.load %arg2[%c392, %c0_6] : memref<400x128xf32, #tpu.memory_space<vmem>>, vector<8x128xf32>
    %6 = vector.extract_strided_slice %5 {offsets = [0, 0], sizes = [1, 128], strides = [1, 1]} : vector<8x128xf32> to vector<1x128xf32>
    %7 = vector.extract_strided_slice %5 {offsets = [1, 0], sizes = [1, 128], strides = [1, 1]} : vector<8x128xf32> to vector<1x128xf32>
    %8 = vector.extract_strided_slice %5 {offsets = [2, 0], sizes = [1, 128], strides = [1, 1]} : vector<8x128xf32> to vector<1x128xf32>
    %9 = vector.extract_strided_slice %5 {offsets = [3, 0], sizes = [1, 128], strides = [1, 1]} : vector<8x128xf32> to vector<1x128xf32>
    %cst = arith.constant dense<0.000000e+00> : vector<8x128xf32>
    %10 = tpu.matmul %0, %1, %cst {dimension_numbers = #tpu.dot_dimension_numbers<[1], [0], [0], [1], [0, 0, 1, 1], [], []>} : vector<8x8xf32>, vector<8x128xf32>, vector<8x128xf32> -> vector<8x128xf32>
    %11 = vector.broadcast %6 : vector<1x128xf32> to vector<8x128xf32>
    %12 = arith.addf %10, %11 : vector<8x128xf32>
    %cst_7 = arith.constant 0.000000e+00 : f32
    %13 = vector.broadcast %cst_7 : f32 to vector<8x128xf32>
    %14 = arith.maximumf %12, %13 : vector<8x128xf32>
    %cst_8 = arith.constant dense<0.000000e+00> : vector<8x128xf32>
    %15 = tpu.matmul %14, %2, %cst_8 {dimension_numbers = #tpu.dot_dimension_numbers<[1], [0], [0], [1], [0, 0, 1, 1], [], []>} : vector<8x128xf32>, vector<128x128xf32>, vector<8x128xf32> -> vector<8x128xf32>
    %16 = vector.broadcast %7 : vector<1x128xf32> to vector<8x128xf32>
    %17 = arith.addf %15, %16 : vector<8x128xf32>
    %cst_9 = arith.constant 0.000000e+00 : f32
    %18 = vector.broadcast %cst_9 : f32 to vector<8x128xf32>
    %19 = arith.maximumf %17, %18 : vector<8x128xf32>
    %cst_10 = arith.constant dense<0.000000e+00> : vector<8x128xf32>
    %20 = tpu.matmul %19, %3, %cst_10 {dimension_numbers = #tpu.dot_dimension_numbers<[1], [0], [0], [1], [0, 0, 1, 1], [], []>} : vector<8x128xf32>, vector<128x128xf32>, vector<8x128xf32> -> vector<8x128xf32>
    %21 = vector.broadcast %8 : vector<1x128xf32> to vector<8x128xf32>
    %22 = arith.addf %20, %21 : vector<8x128xf32>
    %cst_11 = arith.constant 0.000000e+00 : f32
    %23 = vector.broadcast %cst_11 : f32 to vector<8x128xf32>
    %24 = arith.maximumf %22, %23 : vector<8x128xf32>
    %cst_12 = arith.constant dense<0.000000e+00> : vector<8x128xf32>
    %25 = tpu.matmul %24, %4, %cst_12 {dimension_numbers = #tpu.dot_dimension_numbers<[1], [0], [0], [1], [0, 0, 1, 1], [], []>} : vector<8x128xf32>, vector<128x128xf32>, vector<8x128xf32> -> vector<8x128xf32>
    %26 = vector.broadcast %9 : vector<1x128xf32> to vector<8x128xf32>
    %27 = arith.addf %25, %26 : vector<8x128xf32>
    %28 = vector.extract_strided_slice %27 {offsets = [0, 0], sizes = [8, 4], strides = [1, 1]} : vector<8x128xf32> to vector<8x4xf32>
    %29 = vector.extract_strided_slice %27 {offsets = [0, 4], sizes = [8, 1], strides = [1, 1]} : vector<8x128xf32> to vector<8x1xf32>
    %cst_13 = arith.constant dense<0.000000e+00> : vector<8xf32>
    %30 = vector.multi_reduction <add>, %28, %cst_13 [1] : vector<8x4xf32> to vector<8xf32>
    %31 = vector.shape_cast %30 : vector<8xf32> to vector<8x1xf32>
    %cst_14 = arith.constant 4.000000e+00 : f32
    %32 = vector.broadcast %cst_14 : f32 to vector<8x1xf32>
    %33 = arith.divf %31, %32 : vector<8x1xf32>
    %34 = vector.broadcast %33 : vector<8x1xf32> to vector<8x128xf32>
    %35 = arith.subf %27, %34 : vector<8x128xf32>
    %36 = vector.broadcast %29 : vector<8x1xf32> to vector<8x128xf32>
    %37 = arith.addf %36, %35 : vector<8x128xf32>
    %c0_15 = arith.constant 0 : index
    %c0_16 = arith.constant 0 : index
    %38 = vector.load %arg3[%c0_15, %c0_16] : memref<8x128xf32, #tpu.memory_space<vmem>>, vector<8x128xf32>
    tpu.vector_store %arg3[%c0_15, %c0_16], %37 {strides = array<i32>} : memref<8x128xf32, #tpu.memory_space<vmem>>, vector<8x128xf32>,
    return
  }
  func.func @transform_0(%arg0: i32) -> (i32, i32) {
    %c0_i32 = arith.constant 0 : i32
    %c0_i32_0 = arith.constant 0 : i32
    return %arg0, %c0_i32 : i32, i32
  }
  func.func @transform_1(%arg0: i32) -> (i32, i32) {
    %c0_i32 = arith.constant 0 : i32
    %c0_i32_0 = arith.constant 0 : i32
    %c0_i32_1 = arith.constant 0 : i32
    return %c0_i32, %c0_i32_0 : i32, i32
  }
  func.func @transform_2(%arg0: i32) -> (i32, i32) {
    %c0_i32 = arith.constant 0 : i32
    %c0_i32_0 = arith.constant 0 : i32
    return %arg0, %c0_i32 : i32, i32
  }
}

</mosaic_0001>

<bundles_post_ra>
// kernel: forward.1
= control target key start
LH: loop header
LB: loop body
LE: loop exit
PB: predicated region body
PF: predicated region fallthrough
CT: control target
= control target key end

     0   :  { %7 = vsyncpa [#allocation3], 0  ;;  %s666_s9 = smov [#allocation2]   ;;  %s751_s0 = inlined_call_operand.vmem [shape: f32[8,8], index: 0, kind: input, shape index: {}]   ;;  %s752_s1 = inlined_call_operand.hbm [shape: f32[400,128], index: 1, kind: input, shape index: {}]   ;;  %s753_s2 = inlined_call_operand.vmem [shape: f32[8,128], index: 2, kind: output, shape index: {}]  }
   0x1   :  { %s15_s10 = sshll.u32 %s666_s9, 4  ;;  %s642_s13 = scalar_lea.hbm %s752_s1, 6400  ;;  %s16_s10 = int_to_ptr.vmem [resolvable:$true] %s15_s10 }
   0x2   :  { %p643_p0 = scmp.ne.s32.totalorder %s752_s1, %s642_s13  ;;  %p646_p1 = scmp.lt.u32.totalorder %s642_s13, %s752_s1 }
   0x4   :  { %p648_p2 = pnand %p646_p1, %p643_p0 }
   0x6   :  { %651 = shalt.err (!%p648_p2)
}
   0x7   :  { %s652_s18 = scalar_lea.vmem %s16_s10, 6400  ;;  %p657_p4 = scmp.lt.s32.totalorder %s16_s10, %s16_s10 }
   0x8   :  { %p653_p3 = scmp.ne.s32.totalorder %s16_s10, %s652_s18  ;;  %p658_p5 = scmp.lt.s32.totalorder %s652_s18, %s652_s18 }
   0xa   :  { %p659_p6 = por %p658_p5, %p657_p4 }
   0xc   :  { %p660_p7 = pnand %p659_p6, %p653_p3 }
   0xe   :  { %663 = shalt.err (!%p660_p7)
}
   0xf   :  { %s667_s19 = smov 128   ;;  %s668_s20 = smov 8  }
  0x10   :  { %21 = dma.hbm_to_vmem [thread:$0]  %s752_s1, 6400, %s16_s10, [#allocation3], %s667_s19, %s667_s19, %s668_s20  }
  0x11   :  { %664 = dma.done.wait [#allocation3], 6400  }
  0x12   :  { %665 = vsyncadd [#allocation3], 4294960896  ;;  %v669_v0 = vmov 0.0   ;;  %vm670_vm0 = vmmov 0   ;;  %v671_v1 = vmov 0.0|0.0   ;;  %vm80_vm1 = vcmask 64512  }
  0x13   :  { %452 = vmatprep.subr.mxu0 %v669_v0  ;;  %454 = vmatprep.mubr.msk.f32.mxu0 %vm670_vm0, %v669_v0  ;;  %v26_v2 = vld [vmem:[#allocation2] sm:$0xff]  ;;  %v27_v4 = vld [vmem:[#allocation2 + $0x8] sm:$0xff]  ;;  %v28_v5 = vld [vmem:[#allocation2 + $0x10] sm:$0xff]  ;;  %v76_v49 = vlaneseq  ;;  %vm379_vm2 = vcmask 31744  }
  0x14   :  { %562 = vmatprep.subr.bf16.mxu1 %v671_v1  ;;  %489 = vmatprep.mubr.msk.f32.mxu1 %vm670_vm0, %v669_v0  ;;  %v25_v3 = vld [vmem:[%s751_s0] sm:$0xff]  ;;  %v29_v6 = vld [vmem:[#allocation2 + $0x18] sm:$0xff]  ;;  %v563_v8 = vpack.c.bf16 %v28_v5, %v27_v4  ;;  %v31_v10 = vld [vmem:[#allocation2 + $0x28] sm:$0xff] }
  0x15   :  { %453 = vmatpush3.msra.mxu0 %v26_v2  ;;  %v30_v7 = vld [vmem:[#allocation2 + $0x20] sm:$0xff]  ;;  %v32_v11 = vld [vmem:[#allocation2 + $0x30] sm:$0xff]  ;;  %v33_v13 = vld [vmem:[#allocation2 + $0x38] sm:$0xff]  ;;  %v727_v50 = vshrl.u32 %v76_v49, 7 }
  0x16   :  { %455 = vmatmul.mubr.msk.f32.vlgmr.msra.gmra.mrb[0].mxu0 %vm80_vm1, %v25_v3  ;;  %586 = vmatprep.subr.bf16.mxu0 %v671_v1  ;;  %v566_v9 = vpack.c.bf16 %v30_v7, %v29_v6  ;;  %v569_v12 = vpack.c.bf16 %v32_v11, %v31_v10  ;;  %v34_v14 = vld [vmem:[#allocation2 + $0x40] sm:$0xff]  ;;  %v35_v16 = vld [vmem:[#allocation2 + $0x48] sm:$0xff]  ;;  %v36_v17 = vld [vmem:[#allocation2 + $0x50] sm:$0xff] }
  0x17   :  { %524 = vmatprep.mubr.msk.f32.mxu0 %vm670_vm0, %v669_v0  ;;  %564 = vmatpush3.bf16.msra.mxu1 %v563_v8  ;;  %v572_v15 = vpack.c.bf16 %v34_v14, %v33_v13  ;;  %v575_v18 = vpack.c.bf16 %v36_v17, %v35_v16  ;;  %v37_v19 = vld [vmem:[#allocation2 + $0x58] sm:$0xff]  ;;  %v38_v20 = vld [vmem:[#allocation2 + $0x60] sm:$0xff]  ;;  %v39_v22 = vld [vmem:[#allocation2 + $0x68] sm:$0xff]  ;;  %v78_v51 = vsub.s32 0, %v727_v50 }
  0x18   :  { %565 = vmatprep.subr.bf16.mxu1 %v671_v1  ;;  %v578_v21 = vpack.c.bf16 %v38_v20, %v37_v19  ;;  %v40_v23 = vld [vmem:[#allocation2 + $0x70] sm:$0xff]  ;;  %v41_v25 = vld [vmem:[#allocation2 + $0x78] sm:$0xff]  ;;  %v42_v26 = vld [vmem:[#allocation2 + $0x80] sm:$0xff]  ;;  %v157_v19 = vsub.s32 1, %v727_v50 }
  0x19   :  { %v581_v24 = vpack.c.bf16 %v40_v23, %v39_v22  ;;  %v584_v27 = vpack.c.bf16 %v42_v26, %v41_v25  ;;  %v43_v28 = vld [vmem:[#allocation2 + $0x88] sm:$0xff]  ;;  %v44_v29 = vld [vmem:[#allocation2 + $0x90] sm:$0xff]  ;;  %v45_v30 = vld [vmem:[#allocation2 + $0x98] sm:$0xff] }
  0x1a   :  { %v587_v31 = vpack.c.bf16 %v44_v29, %v43_v28  ;;  %v46_v32 = vld [vmem:[#allocation2 + $0xa0] sm:$0xff]  ;;  %v47_v34 = vld [vmem:[#allocation2 + $0xa8] sm:$0xff]  ;;  %v48_v35 = vld [vmem:[#allocation2 + $0xb0] sm:$0xff]  ;;  %v232_v28 = vsub.s32 2, %v727_v50 }
  0x1b   :  { %567 = vmatpush3.bf16.msra.mxu1 %v566_v9  ;;  %v590_v33 = vpack.c.bf16 %v46_v32, %v45_v30  ;;  %v593_v36 = vpack.c.bf16 %v48_v35, %v47_v34  ;;  %v49_v37 = vld [vmem:[#allocation2 + $0xb8] sm:$0xff]  ;;  %v50_v38 = vld [vmem:[#allocation2 + $0xc0] sm:$0xff]  ;;  %v51_v40 = vld [vmem:[#allocation2 + $0xc8] sm:$0xff]  ;;  %v307_v34 = vsub.s32 3, %v727_v50 }
  0x1c   :  { %568 = vmatprep.subr.bf16.mxu1 %v671_v1  ;;  %588 = vmatpush3.bf16.msra.mxu0 %v587_v31  ;;  %v596_v39 = vpack.c.bf16 %v50_v38, %v49_v37  ;;  %v52_v41 = vld [vmem:[#allocation2 + $0xd0] sm:$0xff]  ;;  %v53_v43 = vld [vmem:[#allocation2 + $0xd8] sm:$0xff]  ;;  %v54_v44 = vld [vmem:[#allocation2 + $0xe0] sm:$0xff] }
  0x1d   :  { %589 = vmatprep.subr.bf16.mxu0 %v671_v1  ;;  %v599_v42 = vpack.c.bf16 %v52_v41, %v51_v40  ;;  %v602_v45 = vpack.c.bf16 %v54_v44, %v53_v43  ;;  %v55_v46 = vld [vmem:[#allocation2 + $0xe8] sm:$0xff]  ;;  %v56_v47 = vld [vmem:[#allocation2 + $0xf0] sm:$0xff]  ;;  %v57_v58 = vld [vmem:[#allocation2 + $0xf8] sm:$0xff] }
  0x1e   :  { %v605_v48 = vpack.c.bf16 %v56_v47, %v55_v46  ;;  %v730_v52 = vld [vmem:[#allocation2 + $0x188] sm:$0xff]  ;;  %v58_v59 = vld [vmem:[#allocation2 + $0x100] sm:$0xff]  ;;  %v60_v62 = vld [vmem:[#allocation2 + $0x110] sm:$0xff] }
  0x1f   :  { %570 = vmatpush3.bf16.msra.mxu1 %v569_v12  ;;  %v79_v53 = vrot.slane %v730_v52, %v78_v51  ;;  %v608_v60 = vpack.c.bf16 %v58_v59, %v57_v58  ;;  %v59_v61 = vld [vmem:[#allocation2 + $0x108] sm:$0xff]  ;;  %v61_v63 = vld [vmem:[#allocation2 + $0x118] sm:$0xff]  ;;  %v62_v3 = vld [vmem:[#allocation2 + $0x120] sm:$0xff]  ;;  %v158_v20 = vrot.slane %v730_v52, %v157_v19  ;;  %v233_v29 = vrot.slane %v730_v52, %v232_v28 }
  0x20   :  { %571 = vmatprep.subr.bf16.mxu1 %v671_v1  ;;  %591 = vmatpush3.bf16.msra.mxu0 %v590_v33  ;;  %v611_v2 = vpack.c.bf16 %v60_v62, %v59_v61  ;;  %v614_v4 = vpack.c.bf16 %v62_v3, %v61_v63  ;;  %v63_v5 = vld [vmem:[#allocation2 + $0x128] sm:$0xff]  ;;  %v64_v6 = vld [vmem:[#allocation2 + $0x130] sm:$0xff]  ;;  %v66_v8 = vld [vmem:[#allocation2 + $0x140] sm:$0xff]  ;;  %v672_v33 = vmov 4   ;;  %v308_v35 = vrot.slane %v730_v52, %v307_v34 }
  0x21   :  { %592 = vmatprep.subr.bf16.mxu0 %v671_v1  ;;  %v617_v7 = vpack.c.bf16 %v64_v6, %v63_v5  ;;  %v67_v10 = vld [vmem:[#allocation2 + $0x148] sm:$0xff]  ;;  %v68_v11 = vld [vmem:[#allocation2 + $0x150] sm:$0xff]  ;;  %v69_v13 = vld [vmem:[#allocation2 + $0x158] sm:$0xff]  ;;  %641 = vset.pattern.permute.xlu0 %v672_v33 }
  0x22   :  { %v623_v12 = vpack.c.bf16 %v68_v11, %v67_v10  ;;  %v70_v14 = vld [vmem:[#allocation2 + $0x160] sm:$0xff]  ;;  %v71_v16 = vld [vmem:[#allocation2 + $0x168] sm:$0xff]  ;;  %v72_v17 = vld [vmem:[#allocation2 + $0x170] sm:$0xff] }
  0x23   :  { %573 = vmatpush3.bf16.msra.mxu1 %v572_v15  ;;  %v626_v15 = vpack.c.bf16 %v70_v14, %v69_v13  ;;  %v73_v25 = vld [vmem:[#allocation2 + $0x178] sm:$0xff]  ;;  %v74_v26 = vld [vmem:[#allocation2 + $0x180] sm:$0xff] }
  0x24   :  { %574 = vmatprep.subr.bf16.mxu1 %v671_v1  ;;  %594 = vmatpush3.bf16.msra.mxu0 %v593_v36 }
  0x25   :  { %595 = vmatprep.subr.bf16.mxu0 %v671_v1 }
  0x27   :  { %576 = vmatpush3.bf16.msra.mxu1 %v575_v18  ;;  %v629_v18 = vpack.c.bf16 %v72_v17, %v71_v16 }
  0x28   :  { %577 = vmatprep.subr.bf16.mxu1 %v671_v1  ;;  %597 = vmatpush3.bf16.msra.mxu0 %v596_v39 }
  0x29   :  { %598 = vmatprep.subr.bf16.mxu0 %v671_v1 }
  0x2b   :  { %579 = vmatpush3.bf16.msra.mxu1 %v578_v21 }
  0x2c   :  { %580 = vmatprep.subr.bf16.mxu1 %v671_v1  ;;  %600 = vmatpush3.bf16.msra.mxu0 %v599_v42 }
  0x2d   :  { %601 = vmatprep.subr.bf16.mxu0 %v671_v1 }
  0x2f   :  { %582 = vmatpush3.bf16.msra.mxu1 %v581_v24 }
  0x30   :  { %583 = vmatprep.subr.bf16.mxu1 %v671_v1  ;;  %603 = vmatpush3.bf16.msra.mxu0 %v602_v45 }
  0x31   :  { %604 = vmatprep.subr.bf16.mxu0 %v671_v1 }
  0x33   :  { %585 = vmatpush3.bf16.msra.mxu1 %v584_v27  ;;  %v632_v27 = vpack.c.bf16 %v74_v26, %v73_v25 }
  0x34   :  { %610 = vmatprep.subr.bf16.mxu1 %v671_v1  ;;  %606 = vmatpush3.bf16.msra.mxu0 %v605_v48 }
  0x35   :  { %607 = vmatprep.subr.bf16.mxu0 %v671_v1 }
  0x38   :  { %609 = vmatpush3.bf16.msra.mxu0 %v608_v60 }
  0xe9   :  { %v150_v54 = vpop.f32.mrb[0].mxu0 }
  0xea   :  { %v151_v55 = vadd.f32 %v150_v54, %v79_v53  ;;  %v456_v56 = vpop.f32.mrb[1].mxu0 }
  0xec   :  { %v154_v57 = vmax.f32 %v151_v55, 0.0 }
  0xee   :  { %490 = vmatmul.mubr.f32.vlgmr.msra.gmra.mrb[0].mxu1 %v154_v57 }
  0xef   :  { %559 = vmatprep.mubr.msk.f32.mxu1 %vm670_vm0, %v669_v0  ;;  %612 = vmatpush3.bf16.msra.mxu1 %v611_v2  ;;  %v65_v0 = vld [vmem:[#allocation2 + $0x138] sm:$0xff] }
  0xf0   :  { %613 = vmatprep.subr.bf16.mxu1 %v671_v1  ;;  %v620_v9 = vpack.c.bf16 %v66_v8, %v65_v0 }
  0xf3   :  { %615 = vmatpush3.bf16.msra.mxu1 %v614_v4 }
  0xf4   :  { %616 = vmatprep.subr.bf16.mxu1 %v671_v1 }
  0xf7   :  { %618 = vmatpush3.bf16.msra.mxu1 %v617_v7 }
  0xf8   :  { %619 = vmatprep.subr.bf16.mxu1 %v671_v1 }
  0xfb   :  { %621 = vmatpush3.bf16.msra.mxu1 %v620_v9 }
  0xfc   :  { %622 = vmatprep.subr.bf16.mxu1 %v671_v1 }
  0xff   :  { %624 = vmatpush3.bf16.msra.mxu1 %v623_v12 }
 0x100   :  { %625 = vmatprep.subr.bf16.mxu1 %v671_v1 }
 0x103   :  { %627 = vmatpush3.bf16.msra.mxu1 %v626_v15 }
 0x104   :  { %628 = vmatprep.subr.bf16.mxu1 %v671_v1 }
 0x107   :  { %630 = vmatpush3.bf16.msra.mxu1 %v629_v18 }
 0x108   :  { %631 = vmatprep.subr.bf16.mxu1 %v671_v1 }
 0x10b   :  { %633 = vmatpush3.bf16.msra.mxu1 %v632_v27 }
 0x1c1   :  { %v225_v21 = vpop.f32.mrb[0].mxu1 }
 0x1c2   :  { %v226_v22 = vadd.f32 %v225_v21, %v158_v20  ;;  %v491_v23 = vpop.f32.mrb[1].mxu1 }
 0x1c4   :  { %v229_v24 = vmax.f32 %v226_v22, 0.0 }
 0x1c6   :  { %525 = vmatmul.mubr.f32.vlgmr.msra.gmra.mrb[2].mxu0 %v229_v24 }
 0x299   :  { %v300_v30 = vpop.f32.mrb[2].mxu0 }
 0x29a   :  { %v301_v31 = vadd.f32 %v300_v30, %v233_v29  ;;  %v526_v1 = vpop.f32.mrb[3].mxu0 }
 0x29c   :  { %v304_v32 = vmax.f32 %v301_v31, 0.0 }
 0x29e   :  { %560 = vmatmul.mubr.f32.vlgmr.msra.gmra.mrb[2].mxu1 %v304_v32 }
 0x371   :  { %v375_v36 = vpop.f32.mrb[2].mxu1 }
 0x372   :  { %v376_v37 = vadd.f32 %v375_v36, %v308_v35  ;;  %v561_v38 = vpop.f32.mrb[3].mxu1 }
 0x374   :  { %v380_v39 = vsel %vm379_vm2, %v376_v37, 0.0 }
 0x375   :  { %381 = vadd.xlane.f32.xlu0 %v380_v39 }
 0x38b   :  { %388 = vperm.xlu0 %641, %v376_v37  }
 0x402   :  { %v382_v40 = vpop.xlane.xlu0 %381 }
 0x403   :  { %v384_v41 = vmul.f32 0.25, %v382_v40 }
 0x405   :  { %v385_v42 = vsub.f32 %v376_v37, %v384_v41 }
 0x40a   :  { %v389_v43 = vpop.permute.xlu0 %388 }
 0x40b   :  { %v391_v44 = vadd.f32 %v389_v43, %v385_v42 }
 0x40d   :  { %392 = vst [vmem:[%s753_s2] sm:$0xff] %v391_v44 }
 0x40e   :  { %397 = vsyncpa [#allocation3], 1 }

</bundles_post_ra>
